<compile_context>
chip_gen: v7x
topology: tpu7x:2x2x1
jax: 0.10.0
libtpu: 0.0.40
codegen_flags: <defaults>
</compile_context>

<pallas_src>
import jax
import jax.numpy as jnp
from jax.experimental import pallas as pl
from jax.experimental.pallas import tpu as pltpu


def _round_up(n, m):
    return ((n + m - 1) // m) * m


def _policy_kernel(x_ref, w1_ref, b1_ref, w2_ref, b2_ref, wh_ref, bh_ref,
                   out_ref):
    # Cast activations to the weight dtype (bf16 fast MXU path if params are
    # bf16, no-op for f32); accumulate in f32; tanh / bias adds in f32.
    cdt = w1_ref.dtype
    x = x_ref[...].astype(cdt)
    h1 = jnp.tanh(
        jnp.dot(x, w1_ref[...], preferred_element_type=jnp.float32)
        + b1_ref[...].astype(jnp.float32)
    )
    h2 = jnp.tanh(
        jnp.dot(h1.astype(cdt), w2_ref[...], preferred_element_type=jnp.float32)
        + b2_ref[...].astype(jnp.float32)
    )
    # Fused heads: one matmul, one lane-dense (TILE_B, 2*out_dim) output.
    out_ref[...] = (
        jnp.dot(h2.astype(cdt), wh_ref[...], preferred_element_type=jnp.float32)
        + bh_ref[...].astype(jnp.float32)
    )


def policy_forward(x, params, *, tile_b=512):
    """x: (B, input_dim), any float dtype.
    Returns (mu, logvar), each float32 of shape (B, output_dim)."""
    w1, b1, w2, b2, wmu, bmu, wlv, blv = params
    B, in_dim = x.shape
    hidden_dim = w1.shape[1]
    out_dim = wmu.shape[1]

    # Fuse the two heads: (hidden, 2*out) weight, (1, 2*out) bias.
    wh = jnp.concatenate([wmu, wlv], axis=1)
    bh = jnp.concatenate([bmu, blv], axis=1)

    # Batch tile: multiple of 8 (sublane), no larger than the padded batch.
    tile_b = max(8, _round_up(min(int(tile_b), _round_up(B, 8)), 8))
    B_pad = _round_up(B, tile_b)
    if B_pad != B:
        x = jnp.pad(x, ((0, B_pad - B), (0, 0)))
    grid = (B_pad // tile_b,)

    batch_spec = lambda last: pl.BlockSpec((tile_b, last), lambda i: (i, 0))
    resident = lambda shp: pl.BlockSpec(shp, lambda i: (0, 0))  # stays in VMEM

    out = pl.pallas_call(
        _policy_kernel,
        out_shape=jax.ShapeDtypeStruct((B_pad, 2 * out_dim), jnp.float32),
        grid=grid,
        in_specs=[
            batch_spec(in_dim),          # x   (tiled over batch)
            resident(w1.shape), resident(b1.shape),
            resident(w2.shape), resident(b2.shape),
            resident(wh.shape), resident(bh.shape),
        ],
        out_specs=batch_spec(2 * out_dim),
        compiler_params=pltpu.CompilerParams(
            dimension_semantics=("parallel",),
        ),
    )(x, w1, b1, w2, b2, wh, bh)

    out = out[:B]
    mu = out[:, :out_dim]
    logvar = out[:, out_dim:]
    return mu, logvar


def init_policy_params(key, input_dim, hidden_dim, output_dim):
    """Deterministic init mimicking torch.nn.Linear defaults, plus the
    __mu weight*0.1 / bias*0.0 rescaling from Policy.__init__."""
    keys = jax.random.split(key, 8)

    def linear(kw, kb, fan_in, fan_out):
        bound = 1.0 / jnp.sqrt(fan_in)
        w = jax.random.uniform(kw, (fan_in, fan_out), jnp.float32, -bound, bound)
        b = jax.random.uniform(kb, (1, fan_out), jnp.float32, -bound, bound)
        return w, b

    w1, b1 = linear(keys[0], keys[1], input_dim, hidden_dim)
    w2, b2 = linear(keys[2], keys[3], hidden_dim, hidden_dim)
    wmu, bmu = linear(keys[4], keys[5], hidden_dim, output_dim)
    wmu = wmu * 0.1          # self.__mu.weight.data.mul_(0.1)
    bmu = bmu * 0.0          # self.__mu.bias.data.mul_(0.0)
    wlv, blv = linear(keys[6], keys[7], hidden_dim, output_dim)
    return (w1, b1, w2, b2, wmu, bmu, wlv, blv)


def _reference_forward(x, params):
    w1, b1, w2, b2, wmu, bmu, wlv, blv = params
    x = x.astype(jnp.float32)
    h1 = jnp.tanh(x @ w1 + b1)
    h2 = jnp.tanh(h1 @ w2 + b2)
    return h2 @ wmu + bmu, h2 @ wlv + blv


if __name__ == "__main__":
    input_dim, hidden_dim, output_dim = 16, 32, 8
    batch = 8

    key = jax.random.PRNGKey(0)
    k_x, k_p = jax.random.split(key)
    x = jax.random.normal(k_x, (batch, input_dim), jnp.float32)
    params = init_policy_params(k_p, input_dim, hidden_dim, output_dim)

    mu, logvar = jax.block_until_ready(policy_forward(x, params))
    mu_ref, logvar_ref = _reference_forward(x, params)
    assert mu.shape == (batch, output_dim) and logvar.shape == (batch, output_dim)
    assert jnp.allclose(mu, mu_ref, atol=1e-5), "mu mismatch vs JAX reference"
    assert jnp.allclose(logvar, logvar_ref, atol=1e-5), "logvar mismatch vs JAX reference"

    # Exercise the batched/tiled path (grid > 1, padding of a ragged batch).
    big_b = 300
    xb = jax.random.normal(jax.random.PRNGKey(1), (big_b, input_dim), jnp.float32)
    mu_b, lv_b = jax.block_until_ready(policy_forward(xb, params, tile_b=128))
    mu_b_ref, lv_b_ref = _reference_forward(xb, params)
    assert mu_b.shape == (big_b, output_dim) and lv_b.shape == (big_b, output_dim)
    assert jnp.allclose(mu_b, mu_b_ref, atol=1e-5), "mu mismatch (tiled path)"
    assert jnp.allclose(lv_b, lv_b_ref, atol=1e-5), "logvar mismatch (tiled path)"

    print("KERNEL_OK")
</pallas_src>

<mosaic_0001>
module attributes {stable_mosaic.version = 11 : i64} {
  func.func @_policy_kernel(%arg0: i32, %arg1: memref<8x16xf32, #tpu.memory_space<vmem>>, %arg2: memref<16x32xf32, #tpu.memory_space<vmem>>, %arg3: memref<1x32xf32, #tpu.memory_space<vmem>>, %arg4: memref<32x32xf32, #tpu.memory_space<vmem>>, %arg5: memref<1x32xf32, #tpu.memory_space<vmem>>, %arg6: memref<32x16xf32, #tpu.memory_space<vmem>>, %arg7: memref<1x16xf32, #tpu.memory_space<vmem>>, %arg8: memref<8x16xf32, #tpu.memory_space<vmem>>) attributes {dimension_semantics = [#tpu.dimension_semantics<parallel>], iteration_bounds = array<i64: 1>, scalar_prefetch = 0 : i64, scratch_operands = 0 : i64, tpu.core_type = #tpu.core_type<tc>, window_params = [{transform_indices = @transform_0, window_bounds = array<i64: 8, 16>}, {pipeline_mode = #tpu.pipeline_mode<synchronous>, transform_indices = @transform_1, window_bounds = array<i64: 16, 32>}, {pipeline_mode = #tpu.pipeline_mode<synchronous>, transform_indices = @transform_2, window_bounds = array<i64: 1, 32>}, {pipeline_mode = #tpu.pipeline_mode<synchronous>, transform_indices = @transform_3, window_bounds = array<i64: 32, 32>}, {pipeline_mode = #tpu.pipeline_mode<synchronous>, transform_indices = @transform_4, window_bounds = array<i64: 1, 32>}, {pipeline_mode = #tpu.pipeline_mode<synchronous>, transform_indices = @transform_5, window_bounds = array<i64: 32, 16>}, {pipeline_mode = #tpu.pipeline_mode<synchronous>, transform_indices = @transform_6, window_bounds = array<i64: 1, 16>}, {transform_indices = @transform_7, window_bounds = array<i64: 8, 16>}]} {
    %c0 = arith.constant 0 : index
    %c0_0 = arith.constant 0 : index
    %0 = vector.load %arg1[%c0, %c0_0] : memref<8x16xf32, #tpu.memory_space<vmem>>, vector<8x16xf32>
    %c0_1 = arith.constant 0 : index
    %c0_2 = arith.constant 0 : index
    %1 = vector.load %arg2[%c0_1, %c0_2] : memref<16x32xf32, #tpu.memory_space<vmem>>, vector<16x32xf32>
    %cst = arith.constant dense<0.000000e+00> : vector<8x32xf32>
    %2 = tpu.matmul %0, %1, %cst {dimension_numbers = #tpu.dot_dimension_numbers<[1], [0], [0], [1], [0, 0, 1, 1], [], []>} : vector<8x16xf32>, vector<16x32xf32>, vector<8x32xf32> -> vector<8x32xf32>
    %c0_3 = arith.constant 0 : index
    %c0_4 = arith.constant 0 : index
    %3 = vector.load %arg3[%c0_3, %c0_4] : memref<1x32xf32, #tpu.memory_space<vmem>>, vector<1x32xf32>
    %4 = vector.broadcast %3 : vector<1x32xf32> to vector<8x32xf32>
    %5 = arith.addf %2, %4 : vector<8x32xf32>
    %6 = math.tanh %5 : vector<8x32xf32>
    %c0_5 = arith.constant 0 : index
    %c0_6 = arith.constant 0 : index
    %7 = vector.load %arg4[%c0_5, %c0_6] : memref<32x32xf32, #tpu.memory_space<vmem>>, vector<32x32xf32>
    %cst_7 = arith.constant dense<0.000000e+00> : vector<8x32xf32>
    %8 = tpu.matmul %6, %7, %cst_7 {dimension_numbers = #tpu.dot_dimension_numbers<[1], [0], [0], [1], [0, 0, 1, 1], [], []>} : vector<8x32xf32>, vector<32x32xf32>, vector<8x32xf32> -> vector<8x32xf32>
    %c0_8 = arith.constant 0 : index
    %c0_9 = arith.constant 0 : index
    %9 = vector.load %arg5[%c0_8, %c0_9] : memref<1x32xf32, #tpu.memory_space<vmem>>, vector<1x32xf32>
    %10 = vector.broadcast %9 : vector<1x32xf32> to vector<8x32xf32>
    %11 = arith.addf %8, %10 : vector<8x32xf32>
    %12 = math.tanh %11 : vector<8x32xf32>
    %c0_10 = arith.constant 0 : index
    %c0_11 = arith.constant 0 : index
    %13 = vector.load %arg6[%c0_10, %c0_11] : memref<32x16xf32, #tpu.memory_space<vmem>>, vector<32x16xf32>
    %cst_12 = arith.constant dense<0.000000e+00> : vector<8x16xf32>
    %14 = tpu.matmul %12, %13, %cst_12 {dimension_numbers = #tpu.dot_dimension_numbers<[1], [0], [0], [1], [0, 0, 1, 1], [], []>} : vector<8x32xf32>, vector<32x16xf32>, vector<8x16xf32> -> vector<8x16xf32>
    %c0_13 = arith.constant 0 : index
    %c0_14 = arith.constant 0 : index
    %15 = vector.load %arg7[%c0_13, %c0_14] : memref<1x16xf32, #tpu.memory_space<vmem>>, vector<1x16xf32>
    %16 = vector.broadcast %15 : vector<1x16xf32> to vector<8x16xf32>
    %17 = arith.addf %14, %16 : vector<8x16xf32>
    %c0_15 = arith.constant 0 : index
    %c0_16 = arith.constant 0 : index
    %18 = vector.load %arg8[%c0_15, %c0_16] : memref<8x16xf32, #tpu.memory_space<vmem>>, vector<8x16xf32>
    tpu.vector_store %arg8[%c0_15, %c0_16], %17 {strides = array<i32>} : memref<8x16xf32, #tpu.memory_space<vmem>>, vector<8x16xf32>,
    return
  }
  func.func @transform_0(%arg0: i32) -> (i32, i32) {
    %c0_i32 = arith.constant 0 : i32
    %c0_i32_0 = arith.constant 0 : i32
    return %arg0, %c0_i32 : i32, i32
  }
  func.func @transform_1(%arg0: i32) -> (i32, i32) {
    %c0_i32 = arith.constant 0 : i32
    %c0_i32_0 = arith.constant 0 : i32
    %c0_i32_1 = arith.constant 0 : i32
    return %c0_i32, %c0_i32_0 : i32, i32
  }
  func.func @transform_2(%arg0: i32) -> (i32, i32) {
    %c0_i32 = arith.constant 0 : i32
    %c0_i32_0 = arith.constant 0 : i32
    %c0_i32_1 = arith.constant 0 : i32
    return %c0_i32, %c0_i32_0 : i32, i32
  }
  func.func @transform_3(%arg0: i32) -> (i32, i32) {
    %c0_i32 = arith.constant 0 : i32
    %c0_i32_0 = arith.constant 0 : i32
    %c0_i32_1 = arith.constant 0 : i32
    return %c0_i32, %c0_i32_0 : i32, i32
  }
  func.func @transform_4(%arg0: i32) -> (i32, i32) {
    %c0_i32 = arith.constant 0 : i32
    %c0_i32_0 = arith.constant 0 : i32
    %c0_i32_1 = arith.constant 0 : i32
    return %c0_i32, %c0_i32_0 : i32, i32
  }
  func.func @transform_5(%arg0: i32) -> (i32, i32) {
    %c0_i32 = arith.constant 0 : i32
    %c0_i32_0 = arith.constant 0 : i32
    %c0_i32_1 = arith.constant 0 : i32
    return %c0_i32, %c0_i32_0 : i32, i32
  }
  func.func @transform_6(%arg0: i32) -> (i32, i32) {
    %c0_i32 = arith.constant 0 : i32
    %c0_i32_0 = arith.constant 0 : i32
    %c0_i32_1 = arith.constant 0 : i32
    return %c0_i32, %c0_i32_0 : i32, i32
  }
  func.func @transform_7(%arg0: i32) -> (i32, i32) {
    %c0_i32 = arith.constant 0 : i32
    %c0_i32_0 = arith.constant 0 : i32
    return %arg0, %c0_i32 : i32, i32
  }
}

</mosaic_0001>

<bundles_post_ra>
// kernel: tpu_custom_call.1
= control target key start
LH: loop header
LB: loop body
LE: loop exit
PB: predicated region body
PF: predicated region fallthrough
CT: control target
= control target key end

     0   :  { %12 = vsyncpa [#allocation3], 0  ;;  %s542_s0 = inlined_call_operand.hbm [shape: f32[8,16], index: 0, kind: input, shape index: {}]   ;;  %s543_s1 = inlined_call_operand.vmem [shape: f32[16,32], index: 1, kind: input, shape index: {}]   ;;  %s544_s2 = inlined_call_operand.vmem [shape: f32[1,32], index: 2, kind: input, shape index: {}]   ;;  %s545_s3 = inlined_call_operand.vmem [shape: f32[32,32], index: 3, kind: input, shape index: {}]   ;;  %s546_s4 = inlined_call_operand.vmem [shape: f32[1,32], index: 4, kind: input, shape index: {}]   ;;  %s547_s5 = inlined_call_operand.vmem [shape: f32[32,16], index: 5, kind: input, shape index: {}]   ;;  %s548_s6 = inlined_call_operand.vmem [shape: f32[1,16], index: 6, kind: input, shape index: {}]   ;;  %s549_s7 = inlined_call_operand.hbm [shape: f32[8,16], index: 7, kind: output, shape index: {}]  }
   0x1   :  { %13 = vsyncpa [#allocation4], 0  ;;  %s430_s24 = smov [#allocation2]   ;;  %s382_s28 = scalar_lea.hbm %s542_s0, 128 }
   0x2   :  { %s20_s25 = sshll.u32 %s430_s24, 4  ;;  %p383_p0 = scmp.ne.s32.totalorder %s542_s0, %s382_s28  ;;  %s21_s25 = int_to_ptr.vmem [resolvable:$true] %s20_s25 }
   0x3   :  { %p386_p1 = scmp.lt.u32.totalorder %s382_s28, %s542_s0 }
   0x5   :  { %p388_p2 = pnand %p386_p1, %p383_p0 }
   0x7   :  { %391 = shalt.err (!%p388_p2)
}
   0x8   :  { %s392_s10 = scalar_lea.vmem %s21_s25, 128  ;;  %p397_p4 = scmp.lt.s32.totalorder %s21_s25, %s21_s25 }
   0x9   :  { %p393_p3 = scmp.ne.s32.totalorder %s21_s25, %s392_s10  ;;  %p398_p5 = scmp.lt.s32.totalorder %s392_s10, %s392_s10 }
   0xb   :  { %p399_p6 = por %p398_p5, %p397_p4 }
   0xd   :  { %p400_p7 = pnand %p399_p6, %p393_p3 }
   0xf   :  { %403 = shalt.err (!%p400_p7)
}
  0x10   :  { %23 = dma.hbm_to_vmem [thread:$0]  %s542_s0, 128, %s21_s25, [#allocation3]  }
  0x11   :  { %426 = dma.done.wait [#allocation3], 128  }
  0x12   :  { %427 = vsyncadd [#allocation3], 4294967168  ;;  %v431_v0 = vmov 0.0|0.0   ;;  %vm432_vm0 = vmmov 0   ;;  %v433_v1 = vmov 0.0   ;;  %v40_v2 = vld [vmem:[%s543_s1] sm:$0xff] }
  0x13   :  { %358 = vmatprep.subr.bf16.mxu0 %v431_v0  ;;  %333 = vmatprep.mubr.msk.f32.mxu0 %vm432_vm0, %v433_v1  ;;  %v41_v3 = vld [vmem:[%s543_s1 + $0x8] sm:$0xff]  ;;  %v39_v5 = vld [vmem:[#allocation2] sm:$0xff]  ;;  %vm49_vm1 = vcmask 130048   ;;  %v126_v8 = vld [vmem:[%s545_s3 + $0x10] sm:$0xff]  ;;  %vm135_vm2 = vcmask 261120  }
  0x14   :  { %361 = vmatprep.subr.bf16.mxu1 %v431_v0  ;;  %344 = vmatprep.mubr.msk.f32.mxu1 %vm432_vm0, %v433_v1  ;;  %v359_v4 = vpack.c.bf16 %v41_v3, %v40_v2  ;;  %v124_v6 = vld [vmem:[%s545_s3] sm:$0xff]  ;;  %v125_v7 = vld [vmem:[%s545_s3 + $0x8] sm:$0xff]  ;;  %v127_v10 = vld [vmem:[%s545_s3 + $0x18] sm:$0xff] }
  0x15   :  { %v362_v9 = vpack.c.bf16 %v125_v7, %v124_v6  ;;  %v365_v11 = vpack.c.bf16 %v127_v10, %v126_v8  ;;  %v310_v12 = vld [vmem:[%s544_s2] ss:$0 sm:$0xff]  ;;  %v211_v18 = vld [vmem:[%s547_s5 + $0x8] sm:$0xff]  ;;  %v212_v19 = vld [vmem:[%s547_s5 + $0x10] sm:$0xff] }
  0x16   :  { %360 = vmatpush3.bf16.msra.mxu0 %v359_v4  ;;  %v210_v17 = vld [vmem:[%s547_s5] sm:$0xff]  ;;  %v213_v21 = vld [vmem:[%s547_s5 + $0x18] sm:$0xff]  ;;  %s434_s5 = smov [#allocation5]  }
  0x17   :  { %367 = vmatprep.subr.bf16.mxu0 %v431_v0  ;;  %363 = vmatpush3.bf16.msra.mxu1 %v362_v9  ;;  %v368_v20 = vpack.c.bf16 %v211_v18, %v210_v17  ;;  %v371_v22 = vpack.c.bf16 %v213_v21, %v212_v19  ;;  %v312_v23 = vld [vmem:[%s546_s4] ss:$0 sm:$0xff]  ;;  %s301_s12 = sshll.u32 %s434_s5, 4  ;;  %s302_s12 = int_to_ptr.vmem [resolvable:$true] %s301_s12 }
  0x18   :  { %364 = vmatprep.subr.bf16.mxu1 %v431_v0  ;;  %v314_v28 = vld [vmem:[%s548_s6] ss:$0 sm:$0xff]  ;;  %s404_s4 = scalar_lea.vmem %s302_s12, 128  ;;  %p409_p9 = scmp.lt.s32.totalorder %s302_s12, %s302_s12 }
  0x19   :  { %334 = vmatmul.mubr.msk.f32.vlgmr.msra.gmra.mrb[0].mxu0 %vm49_vm1, %v39_v5  ;;  %p405_p8 = scmp.ne.s32.totalorder %s302_s12, %s404_s4  ;;  %p410_p10 = scmp.lt.s32.totalorder %s404_s4, %s404_s4 }
  0x1a   :  { %355 = vmatprep.mubr.msk.f32.mxu0 %vm432_vm0, %v433_v1  ;;  %369 = vmatpush3.bf16.msra.mxu0 %v368_v20 }
  0x1b   :  { %366 = vmatpush3.bf16.msra.mxu1 %v365_v11  ;;  %370 = vmatprep.subr.bf16.mxu0 %v431_v0  ;;  %p411_p11 = por %p410_p10, %p409_p9 }
  0x1d   :  { %p412_p12 = pnand %p411_p11, %p405_p8 }
  0x1e   :  { %372 = vmatpush3.bf16.msra.mxu0 %v371_v22 }
  0xec   :  { %v119_v13 = vpop.f32.mrb[0].mxu0 }
  0xed   :  { %v120_v14 = vadd.f32 %v310_v12, %v119_v13  ;;  %v335_v15 = vpop.f32.mrb[1].mxu0 }
  0xef   :  { %378 = vtanh.f32 %v120_v14 }
  0xf9   :  { %v379_v16 = vpop.eup %378 }
  0xfa   :  { %345 = vmatmul.mubr.msk.f32.vlgmr.msra.gmra.mrb[0].mxu1 %vm135_vm2, %v379_v16 }
 0x1cd   :  { %v205_v24 = vpop.f32.mrb[0].mxu1 }
 0x1ce   :  { %v206_v25 = vadd.f32 %v312_v23, %v205_v24  ;;  %v346_v26 = vpop.f32.mrb[1].mxu1 }
 0x1d0   :  { %380 = vtanh.f32 %v206_v25 }
 0x1da   :  { %v381_v27 = vpop.eup %380 }
 0x1db   :  { %356 = vmatmul.mubr.msk.f32.vlgmr.msra.gmra.mrb[2].mxu0 %vm135_vm2, %v381_v27 }
 0x2ae   :  { %v290_v29 = vpop.f32.mrb[2].mxu0 }
 0x2af   :  { %v291_v30 = vadd.f32 %v314_v28, %v290_v29  ;;  %v357_v31 = vpop.f32.mrb[3].mxu0 }
 0x2b1   :  { %294 = vst.msk [vmem:[#allocation5] sm:$0xff] %vm49_vm1, %v291_v30 }
 0x2b2   :  { %415 = shalt.err (!%p412_p12)
}
 0x2b3   :  { %s416_s15 = scalar_lea.hbm %s549_s7, 128 }
 0x2b4   :  { %p417_p13 = scmp.ne.s32.totalorder %s549_s7, %s416_s15  ;;  %p420_p0 = scmp.lt.u32.totalorder %s416_s15, %s549_s7 }
 0x2b6   :  { %p422_p1 = pnand %p420_p0, %p417_p13 }
 0x2b8   :  { %425 = shalt.err (!%p422_p1)
}
 0x2b9   :  { %304 = dma.vmem_to_hbm [thread:$0]  %s302_s12, 128, %s549_s7, [#allocation4]  }
 0x2ba   :  { %428 = dma.done.wait [#allocation4], 128  }
 0x2bb   :  { %429 = vsyncadd [#allocation4], 4294967168 }
 0x2bc   :  { %308 = vsyncpa [#allocation3], 1 }
 0x2bd   :  { %309 = vsyncpa [#allocation4], 1 }

</bundles_post_ra>
